<compile_context>
chip_gen: v7x
topology: tpu7x:2x2x1
jax: 0.10.0
libtpu: 0.0.40
codegen_flags: <defaults>
</compile_context>

<pallas_src>
import functools

import jax
import jax.numpy as jnp
from jax.experimental import pallas as pl
from jax.experimental.pallas import tpu as pltpu


def _round_up(x, m):
    return ((x + m - 1) // m) * m


# --------------------------------------------------------------------------
# Kernel
# --------------------------------------------------------------------------
def _w2v_kernel(x_ref, w1_ref, b1_ref, w2_ref, b2_ref, o_ref,
                h_ref, m_ref, l_ref):
    """Grid = (B tiles, V tiles); V is the inner (streamed) axis.

    x:  (tm, CE)  bf16    w1: (CE, H) bf16    b1: (1, H)  f32
    w2: (H, tn)   bf16    b2: (1, tn) f32     o:  (tm, Vp) f32  (VMEM-resident)
    h:  (tm, H)   bf16 scratch   m, l: (tm, 1) f32 scratch
    """
    j = pl.program_id(1)
    nj = pl.num_programs(1)
    tn = w2_ref.shape[1]

    # First V tile of this row tile: compute the hidden activation once and
    # reset the online-LSE state.
    @pl.when(j == 0)
    def _init():
        h = jnp.dot(x_ref[...], w1_ref[...],
                    preferred_element_type=jnp.float32) + b1_ref[...]
        h_ref[...] = jnp.maximum(h, 0.0).astype(h_ref.dtype)
        m_ref[...] = jnp.full(m_ref.shape, -1e30, dtype=m_ref.dtype)
        l_ref[...] = jnp.zeros(l_ref.shape, dtype=l_ref.dtype)

    # Logits for this vocab tile (bf16 MXU, f32 accumulation).
    logits = jnp.dot(h_ref[...], w2_ref[...],
                     preferred_element_type=jnp.float32) + b2_ref[...]

    # Online log-sum-exp update (running max + rescaled running sum), all f32.
    m_prev = m_ref[...]
    m_new = jnp.maximum(m_prev, jnp.max(logits, axis=-1, keepdims=True))
    l_ref[...] = (l_ref[...] * jnp.exp(m_prev - m_new)
                  + jnp.sum(jnp.exp(logits - m_new), axis=-1, keepdims=True))
    m_ref[...] = m_new

    # Lane-aligned (128-multiple) store of the raw logits tile into the
    # resident 2-D output block -> full unmasked vector stores.
    col = pl.multiple_of(j * tn, 128)
    o_ref[:, pl.ds(col, tn)] = logits

    # Last V tile: normalize everything in place -> log-probabilities.
    @pl.when(j == nj - 1)
    def _finalize():
        lse = m_ref[...] + jnp.log(l_ref[...])          # (tm, 1)
        o_ref[...] = o_ref[...] - lse


# --------------------------------------------------------------------------
# Tiling / VMEM budgeting (generation aware)
# --------------------------------------------------------------------------
def _vmem_capacity_bytes():
    try:
        return int(pltpu.get_tpu_info().vmem_capacity_bytes)
    except Exception:
        return 64 * 1024 * 1024          # conservative (v7x per-TensorCore)


def _select_tiling(B, CE, H, Vp, tn):
    vmem_cap = _vmem_capacity_bytes()
    big_vmem = vmem_cap >= 100 * 1024 * 1024       # v5e / v6e (128 MiB)

    # Resident-output (f32) budget; the pipeline may double-buffer it.
    out_budget = (40 if big_vmem else 20) * 1024 * 1024

    tm = min(256, _round_up(B, 8))
    tm_cap = max(8, (out_budget // (Vp * 4)) // 8 * 8)
    tm = max(8, min(tm, tm_cap))

    # v7x-class parts have 2 TensorCores: keep >= 2 batch tiles so the
    # "parallel" axis actually feeds both cores.
    if (not big_vmem) and B >= 16:
        tm = min(tm, max(8, _round_up((B + 1) // 2, 8)))

    # MXU-friendly multiple of 128 when affordable.
    if tm >= 128:
        tm = (tm // 128) * 128

    # Explicit scoped-VMEM limit computed from the actual buffers.
    out_bytes = 2 * tm * Vp * 4                    # resident output (x2)
    w2_bytes = 2 * (H * tn * 2 + tn * 4)           # streamed w2/b2 tiles (x2)
    w1_bytes = 2 * (CE * H * 2 + H * 4)            # resident w1/b1
    x_bytes = 2 * tm * CE * 2                      # activation tile (x2)
    scratch = tm * H * 2 + 2 * tm * 4              # h + m + l
    total = out_bytes + w2_bytes + w1_bytes + x_bytes + scratch
    vmem_limit = int(total * 1.2) + (1 << 20)      # headroom
    vmem_limit = max(vmem_limit, 16 * 1024 * 1024)
    vmem_limit = min(vmem_limit, int(vmem_cap * 0.9))
    return tm, vmem_limit


# --------------------------------------------------------------------------
# Parameter preparation (hoisted out of the per-call forward path)
# --------------------------------------------------------------------------
def prepare_params(params, tn=None):
    """One-time weight preprocessing: bf16 casts + vocab padding."""
    emb, w1, b1, w2, b2 = (params["emb"], params["w1"], params["b1"],
                           params["w2"], params["b2"])
    H = w1.shape[1]
    V = w2.shape[1]
    if tn is None:
        tn = 512 if V >= 4096 else (256 if V >= 512 else 128)
    Vp = _round_up(V, tn)

    w1_bf = w1.astype(jnp.bfloat16)
    w2_bf = jnp.pad(w2, ((0, 0), (0, Vp - V))).astype(jnp.bfloat16)
    b1_2d = b1.reshape(1, H).astype(jnp.float32)
    # Padded vocab columns get a huge negative bias so they never affect the
    # LSE (do NOT switch to -inf: inf-inf would NaN in the online update).
    b2_2d = jnp.pad(b2.astype(jnp.float32), (0, Vp - V),
                    constant_values=-1e30).reshape(1, Vp)
    return {"emb": emb, "w1_bf": w1_bf, "b1": b1_2d,
            "w2_bf": w2_bf, "b2": b2_2d, "V": V, "tn": tn}


# --------------------------------------------------------------------------
# Forward
# --------------------------------------------------------------------------
@functools.partial(jax.jit, static_argnames=("tm", "tn", "V", "vmem_limit"))
def _forward_impl(inputs, emb, w1_bf, b1_2d, w2_bf, b2_2d,
                  *, tm, tn, V, vmem_limit):
    B = inputs.shape[0]
    CE, H = w1_bf.shape
    Vp = w2_bf.shape[1]
    num_v = Vp // tn
    Bp = _round_up(B, tm)
    num_b = Bp // tm

    # Embedding gather + flatten (JAX glue), pad rows & cast to bf16.
    # TODO(synk): fuse this gather into the kernel via scalar prefetch.
    embeds = jnp.take(emb, inputs, axis=0).reshape(B, -1)          # (B, CE) f32
    x = jnp.pad(embeds, ((0, Bp - B), (0, 0))).astype(jnp.bfloat16)

    out = pl.pallas_call(
        _w2v_kernel,
        out_shape=jax.ShapeDtypeStruct((Bp, Vp), jnp.float32),
        grid_spec=pltpu.PrefetchScalarGridSpec(
            num_scalar_prefetch=0,
            grid=(num_b, num_v),                      # V (streamed) innermost
            in_specs=[
                pl.BlockSpec((tm, CE), lambda i, j: (i, 0)),   # activations
                pl.BlockSpec((CE, H), lambda i, j: (0, 0)),    # w1 (resident)
                pl.BlockSpec((1, H), lambda i, j: (0, 0)),     # b1 (resident)
                pl.BlockSpec((H, tn), lambda i, j: (0, j)),    # w2 tile (streamed)
                pl.BlockSpec((1, tn), lambda i, j: (0, j)),    # b2 tile (streamed)
            ],
            out_specs=pl.BlockSpec((tm, Vp), lambda i, j: (i, 0)),  # resident
            scratch_shapes=[
                pltpu.VMEM((tm, H), jnp.bfloat16),   # cached hidden activation
                pltpu.VMEM((tm, 1), jnp.float32),    # running max
                pltpu.VMEM((tm, 1), jnp.float32),    # running sum-exp
            ],
        ),
        compiler_params=pltpu.CompilerParams(
            dimension_semantics=("parallel", "arbitrary"),
            vmem_limit_bytes=vmem_limit),
    )(x, w1_bf, b1_2d, w2_bf, b2_2d)

    return out[:B, :V]


def word2vec_forward(inputs, prepared):
    """inputs: (B, context) int32 token ids. Returns (B, vocab+1) log-probs."""
    w1_bf = prepared["w1_bf"]
    w2_bf = prepared["w2_bf"]
    tn = prepared["tn"]
    V = prepared["V"]
    B = inputs.shape[0]
    CE, H = w1_bf.shape
    Vp = w2_bf.shape[1]
    tm, vmem_limit = _select_tiling(B, CE, H, Vp, tn)
    return _forward_impl(inputs, prepared["emb"], w1_bf, prepared["b1"],
                         w2_bf, prepared["b2"],
                         tm=tm, tn=tn, V=V, vmem_limit=vmem_limit)


# --------------------------------------------------------------------------
# Init + test
# --------------------------------------------------------------------------
def init_params(key, vocab_size, embedding_dim, context_size, hidden=1024):
    V = vocab_size + 1                       # the module adds 1 to vocab_size
    CE = context_size * embedding_dim
    k = jax.random.split(key, 5)
    emb = jax.random.normal(k[0], (V, embedding_dim), jnp.float32)
    # nn.Linear stores weight as (out, in); pre-transpose to (in, out) here.
    w1 = jax.random.normal(k[1], (CE, hidden), jnp.float32) * (1.0 / jnp.sqrt(CE))
    b1 = jax.random.normal(k[2], (hidden,), jnp.float32) * 0.01
    w2 = jax.random.normal(k[3], (hidden, V), jnp.float32) * (1.0 / jnp.sqrt(hidden))
    b2 = jax.random.normal(k[4], (V,), jnp.float32) * 0.01
    return {"emb": emb, "w1": w1, "b1": b1, "w2": w2, "b2": b2}


if __name__ == "__main__":
    vocab_size = 300          # module uses vocab_size + 1 = 301 (exercises V padding)
    embedding_dim = 32
    context_size = 4          # C*E = 128
    batch = 8

    key = jax.random.PRNGKey(0)
    pkey, ikey = jax.random.split(key)
    params = init_params(pkey, vocab_size, embedding_dim, context_size)
    inputs = jax.random.randint(ikey, (batch, context_size), 0, vocab_size + 1,
                                dtype=jnp.int32)

    prepared = prepare_params(params)       # one-time weight prep (hoisted)
    log_probs = jax.block_until_ready(word2vec_forward(inputs, prepared))

    # Reference check (pure JAX, same bf16 weight/activation casts, f32 accum).
    V = vocab_size + 1
    embeds = jnp.take(params["emb"], inputs, axis=0).reshape(batch, -1)
    x_bf = embeds.astype(jnp.bfloat16)
    w1_bf = params["w1"].astype(jnp.bfloat16)
    w2_bf = params["w2"].astype(jnp.bfloat16)
    h = jnp.maximum(jnp.dot(x_bf, w1_bf, preferred_element_type=jnp.float32)
                    + params["b1"], 0.0)
    logits = (jnp.dot(h.astype(jnp.bfloat16), w2_bf,
                      preferred_element_type=jnp.float32) + params["b2"])
    ref = jax.nn.log_softmax(logits, axis=1)

    assert log_probs.shape == (batch, V), log_probs.shape
    assert bool(jnp.all(jnp.isfinite(log_probs)))
    err = float(jnp.max(jnp.abs(log_probs - ref)))
    assert jnp.allclose(log_probs, ref, atol=1e-2, rtol=1e-2), err

    print("KERNEL_OK")
</pallas_src>

<mosaic_0001>
module attributes {stable_mosaic.version = 11 : i64} {
  func.func @_w2v_kernel(%arg0: i32, %arg1: i32, %arg2: memref<8x128xbf16, #tpu.memory_space<vmem>>, %arg3: memref<128x1024xbf16, #tpu.memory_space<vmem>>, %arg4: memref<1x1024xf32, #tpu.memory_space<vmem>>, %arg5: memref<1024x128xbf16, #tpu.memory_space<vmem>>, %arg6: memref<1x128xf32, #tpu.memory_space<vmem>>, %arg7: memref<8x384xf32, #tpu.memory_space<vmem>>, %arg8: memref<8x1024xbf16, #tpu.memory_space<vmem>>, %arg9: memref<8x1xf32, #tpu.memory_space<vmem>>, %arg10: memref<8x1xf32, #tpu.memory_space<vmem>>) attributes {dimension_semantics = [#tpu.dimension_semantics<parallel>, #tpu.dimension_semantics<arbitrary>], iteration_bounds = array<i64: 1, 3>, scalar_prefetch = 0 : i64, scratch_operands = 3 : i64, tpu.core_type = #tpu.core_type<tc>, window_params = [{transform_indices = @transform_0, window_bounds = array<i64: 8, 128>}, {pipeline_mode = #tpu.pipeline_mode<synchronous>, transform_indices = @transform_1, window_bounds = array<i64: 128, 1024>}, {pipeline_mode = #tpu.pipeline_mode<synchronous>, transform_indices = @transform_2, window_bounds = array<i64: 1, 1024>}, {transform_indices = @transform_3, window_bounds = array<i64: 1024, 128>}, {transform_indices = @transform_4, window_bounds = array<i64: 1, 128>}, {transform_indices = @transform_5, window_bounds = array<i64: 8, 384>}]} {
    %c0_i32 = arith.constant 0 : i32
    %0 = arith.cmpi eq, %arg1, %c0_i32 : i32
    %1 = arith.extui %0 : i1 to i32
    %c0_i32_0 = arith.constant 0 : i32
    %2 = arith.cmpi ne, %1, %c0_i32_0 : i32
    scf.if %2 {
      %c0_18 = arith.constant 0 : index
      %c0_19 = arith.constant 0 : index
      %32 = vector.load %arg2[%c0_18, %c0_19] : memref<8x128xbf16, #tpu.memory_space<vmem>>, vector<8x128xbf16>
      %c0_20 = arith.constant 0 : index
      %c0_21 = arith.constant 0 : index
      %33 = vector.load %arg3[%c0_20, %c0_21] : memref<128x1024xbf16, #tpu.memory_space<vmem>>, vector<128x1024xbf16>
      %cst_22 = arith.constant dense<0.000000e+00> : vector<8x1024xf32>
      %34 = tpu.matmul %32, %33, %cst_22 {dimension_numbers = #tpu.dot_dimension_numbers<[1], [0], [0], [1], [0, 0, 1, 1], [], []>} : vector<8x128xbf16>, vector<128x1024xbf16>, vector<8x1024xf32> -> vector<8x1024xf32>
      %c0_23 = arith.constant 0 : index
      %c0_24 = arith.constant 0 : index
      %35 = vector.load %arg4[%c0_23, %c0_24] : memref<1x1024xf32, #tpu.memory_space<vmem>>, vector<1x1024xf32>
      %36 = vector.broadcast %35 : vector<1x1024xf32> to vector<8x1024xf32>
      %37 = arith.addf %34, %36 : vector<8x1024xf32>
      %cst_25 = arith.constant 0.000000e+00 : f32
      %38 = vector.broadcast %cst_25 : f32 to vector<8x1024xf32>
      %39 = arith.maximumf %37, %38 : vector<8x1024xf32>
      %40 = arith.truncf %39 : vector<8x1024xf32> to vector<8x1024xbf16>
      %c0_26 = arith.constant 0 : index
      %c0_27 = arith.constant 0 : index
      %41 = vector.load %arg8[%c0_26, %c0_27] : memref<8x1024xbf16, #tpu.memory_space<vmem>>, vector<8x1024xbf16>
      tpu.vector_store %arg8[%c0_26, %c0_27], %40 {strides = array<i32>} : memref<8x1024xbf16, #tpu.memory_space<vmem>>, vector<8x1024xbf16>,
      %cst_28 = arith.constant -1.000000e+30 : f32
      %42 = vector.broadcast %cst_28 : f32 to vector<8x1xf32>
      %c0_29 = arith.constant 0 : index
      %c0_30 = arith.constant 0 : index
      %43 = vector.load %arg9[%c0_29, %c0_30] : memref<8x1xf32, #tpu.memory_space<vmem>>, vector<8x1xf32>
      tpu.vector_store %arg9[%c0_29, %c0_30], %42 {strides = array<i32>} : memref<8x1xf32, #tpu.memory_space<vmem>>, vector<8x1xf32>,
      %cst_31 = arith.constant 0.000000e+00 : f32
      %44 = vector.broadcast %cst_31 : f32 to vector<8x1xf32>
      %c0_32 = arith.constant 0 : index
      %c0_33 = arith.constant 0 : index
      %45 = vector.load %arg10[%c0_32, %c0_33] : memref<8x1xf32, #tpu.memory_space<vmem>>, vector<8x1xf32>
      tpu.vector_store %arg10[%c0_32, %c0_33], %44 {strides = array<i32>} : memref<8x1xf32, #tpu.memory_space<vmem>>, vector<8x1xf32>,
    } else {
    }
    %c0 = arith.constant 0 : index
    %c0_1 = arith.constant 0 : index
    %3 = vector.load %arg8[%c0, %c0_1] : memref<8x1024xbf16, #tpu.memory_space<vmem>>, vector<8x1024xbf16>
    %c0_2 = arith.constant 0 : index
    %c0_3 = arith.constant 0 : index
    %4 = vector.load %arg5[%c0_2, %c0_3] : memref<1024x128xbf16, #tpu.memory_space<vmem>>, vector<1024x128xbf16>
    %cst = arith.constant dense<0.000000e+00> : vector<8x128xf32>
    %5 = tpu.matmul %3, %4, %cst {dimension_numbers = #tpu.dot_dimension_numbers<[1], [0], [0], [1], [0, 0, 1, 1], [], []>} : vector<8x1024xbf16>, vector<1024x128xbf16>, vector<8x128xf32> -> vector<8x128xf32>
    %c0_4 = arith.constant 0 : index
    %c0_5 = arith.constant 0 : index
    %6 = vector.load %arg6[%c0_4, %c0_5] : memref<1x128xf32, #tpu.memory_space<vmem>>, vector<1x128xf32>
    %7 = vector.broadcast %6 : vector<1x128xf32> to vector<8x128xf32>
    %8 = arith.addf %5, %7 : vector<8x128xf32>
    %c0_6 = arith.constant 0 : index
    %c0_7 = arith.constant 0 : index
    %9 = vector.load %arg9[%c0_6, %c0_7] : memref<8x1xf32, #tpu.memory_space<vmem>>, vector<8x1xf32>
    %cst_8 = arith.constant dense<0xFF800000> : vector<8xf32>
    %10 = vector.multi_reduction <maximumf>, %8, %cst_8 [1] : vector<8x128xf32> to vector<8xf32>
    %11 = vector.shape_cast %10 : vector<8xf32> to vector<8x1xf32>
    %12 = arith.maximumf %9, %11 : vector<8x1xf32>
    %c0_9 = arith.constant 0 : index
    %c0_10 = arith.constant 0 : index
    %13 = vector.load %arg10[%c0_9, %c0_10] : memref<8x1xf32, #tpu.memory_space<vmem>>, vector<8x1xf32>
    %14 = arith.subf %9, %12 : vector<8x1xf32>
    %15 = math.exp %14 : vector<8x1xf32>
    %16 = arith.mulf %13, %15 : vector<8x1xf32>
    %17 = vector.broadcast %12 : vector<8x1xf32> to vector<8x128xf32>
    %18 = arith.subf %8, %17 : vector<8x128xf32>
    %19 = math.exp %18 : vector<8x128xf32>
    %cst_11 = arith.constant dense<0.000000e+00> : vector<8xf32>
    %20 = vector.multi_reduction <add>, %19, %cst_11 [1] : vector<8x128xf32> to vector<8xf32>
    %21 = vector.shape_cast %20 : vector<8xf32> to vector<8x1xf32>
    %22 = arith.addf %16, %21 : vector<8x1xf32>
    %c0_12 = arith.constant 0 : index
    %c0_13 = arith.constant 0 : index
    %23 = vector.load %arg10[%c0_12, %c0_13] : memref<8x1xf32, #tpu.memory_space<vmem>>, vector<8x1xf32>
    tpu.vector_store %arg10[%c0_12, %c0_13], %22 {strides = array<i32>} : memref<8x1xf32, #tpu.memory_space<vmem>>, vector<8x1xf32>,
    %c0_14 = arith.constant 0 : index
    %c0_15 = arith.constant 0 : index
    %24 = vector.load %arg9[%c0_14, %c0_15] : memref<8x1xf32, #tpu.memory_space<vmem>>, vector<8x1xf32>
    tpu.vector_store %arg9[%c0_14, %c0_15], %12 {strides = array<i32>} : memref<8x1xf32, #tpu.memory_space<vmem>>, vector<8x1xf32>,
    %c128_i32 = arith.constant 128 : i32
    %25 = arith.muli %arg1, %c128_i32 : i32
    %26 = tpu.assume_multiple %25, 128 : i32
    %c0_16 = arith.constant 0 : index
    %27 = arith.index_cast %26 : i32 to index
    %28 = vector.load %arg7[%c0_16, %27] : memref<8x384xf32, #tpu.memory_space<vmem>>, vector<8x128xf32>
    tpu.vector_store %arg7[%c0_16, %27], %8 {strides = array<i32>} : memref<8x384xf32, #tpu.memory_space<vmem>>, vector<8x128xf32>,
    %c2_i32 = arith.constant 2 : i32
    %29 = arith.cmpi eq, %arg1, %c2_i32 : i32
    %30 = arith.extui %29 : i1 to i32
    %c0_i32_17 = arith.constant 0 : i32
    %31 = arith.cmpi ne, %30, %c0_i32_17 : i32
    scf.if %31 {
      %c0_18 = arith.constant 0 : index
      %c0_19 = arith.constant 0 : index
      %32 = vector.load %arg9[%c0_18, %c0_19] : memref<8x1xf32, #tpu.memory_space<vmem>>, vector<8x1xf32>
      %c0_20 = arith.constant 0 : index
      %c0_21 = arith.constant 0 : index
      %33 = vector.load %arg10[%c0_20, %c0_21] : memref<8x1xf32, #tpu.memory_space<vmem>>, vector<8x1xf32>
      %34 = math.log %33 : vector<8x1xf32>
      %35 = arith.addf %32, %34 : vector<8x1xf32>
      %c0_22 = arith.constant 0 : index
      %c0_23 = arith.constant 0 : index
      %36 = vector.load %arg7[%c0_22, %c0_23] : memref<8x384xf32, #tpu.memory_space<vmem>>, vector<8x384xf32>
      %37 = vector.broadcast %35 : vector<8x1xf32> to vector<8x384xf32>
      %38 = arith.subf %36, %37 : vector<8x384xf32>
      %c0_24 = arith.constant 0 : index
      %c0_25 = arith.constant 0 : index
      %39 = vector.load %arg7[%c0_24, %c0_25] : memref<8x384xf32, #tpu.memory_space<vmem>>, vector<8x384xf32>
      tpu.vector_store %arg7[%c0_24, %c0_25], %38 {strides = array<i32>} : memref<8x384xf32, #tpu.memory_space<vmem>>, vector<8x384xf32>,
    } else {
    }
    return
  }
  func.func @transform_0(%arg0: i32, %arg1: i32) -> (i32, i32) {
    %c0_i32 = arith.constant 0 : i32
    %c0_i32_0 = arith.constant 0 : i32
    return %arg0, %c0_i32 : i32, i32
  }
  func.func @transform_1(%arg0: i32, %arg1: i32) -> (i32, i32) {
    %c0_i32 = arith.constant 0 : i32
    %c0_i32_0 = arith.constant 0 : i32
    %c0_i32_1 = arith.constant 0 : i32
    return %c0_i32, %c0_i32_0 : i32, i32
  }
  func.func @transform_2(%arg0: i32, %arg1: i32) -> (i32, i32) {
    %c0_i32 = arith.constant 0 : i32
    %c0_i32_0 = arith.constant 0 : i32
    %c0_i32_1 = arith.constant 0 : i32
    return %c0_i32, %c0_i32_0 : i32, i32
  }
  func.func @transform_3(%arg0: i32, %arg1: i32) -> (i32, i32) {
    %c0_i32 = arith.constant 0 : i32
    %c0_i32_0 = arith.constant 0 : i32
    return %c0_i32, %arg1 : i32, i32
  }
  func.func @transform_4(%arg0: i32, %arg1: i32) -> (i32, i32) {
    %c0_i32 = arith.constant 0 : i32
    %c0_i32_0 = arith.constant 0 : i32
    return %c0_i32, %arg1 : i32, i32
  }
  func.func @transform_5(%arg0: i32, %arg1: i32) -> (i32, i32) {
    %c0_i32 = arith.constant 0 : i32
    %c0_i32_0 = arith.constant 0 : i32
    return %arg0, %c0_i32 : i32, i32
  }
}

</mosaic_0001>

<bundles_post_ra>
// kernel: _forward_impl.1
= control target key start
LH: loop header
LB: loop body
LE: loop exit
PB: predicated region body
PF: predicated region fallthrough
CT: control target
= control target key end

     0   :  { %10 = vsyncpa [#allocation6], 0  ;;  %s2694_s0 = inlined_call_operand.vmem [shape: bf16[8,128], index: 0, kind: input, shape index: {}]   ;;  %s2695_s1 = inlined_call_operand.hbm [shape: bf16[128,1024], index: 1, kind: input, shape index: {}]   ;;  %s2696_s2 = inlined_call_operand.vmem [shape: f32[1,1024], index: 2, kind: input, shape index: {}]   ;;  %s2697_s3 = inlined_call_operand.hbm [shape: bf16[1024,384], index: 3, kind: input, shape index: {}]   ;;  %s2698_s4 = inlined_call_operand.vmem [shape: f32[1,384], index: 4, kind: input, shape index: {}]   ;;  %s2699_s5 = inlined_call_operand.hbm [shape: f32[8,384], index: 5, kind: output, shape index: {}]  }
   0x1   :  { %11 = vsyncpa [#allocation9], 0 }
   0x2   :  { %13 = vsyncpa [#allocation9 + $0x1], 0 }
   0x3   :  { %14 = vsyncpa [#allocation7], 0  ;;  %s2409_s18 = smov 0   ;;  %s2411_s19 = smov 0  }
   0x4   :  { %s2413_s20 = smov 0   ;;  %s2415_s21 = smov 0  }
   0x5   :  { %s2417_s22 = smov 0   ;;  %s2419_s23 = smov 0  }
   0x6 LB: > { %s1808_s24 = sadd.s32 4294967295, %s2364_s23   ;;  %p114_p0 = scmp.ne.s32.totalorder %s2352_s20, %s2348_s19  ;;  %s2364_s23 = sphi %s2419_s23, %s20_s23   ;;  %s2360_s22 = sphi %s2417_s22, %s2719_s22   ;;  %s2356_s21 = sphi %s2415_s21, %s2718_s21   ;;  %s2352_s20 = sphi %s2413_s20, %s2717_s20   ;;  %s2348_s19 = sphi %s2411_s19, %s2716_s19   ;;  %s2344_s18 = sphi %s2409_s18, %s2715_s18  }
   0x7   : > { %p115_p1 = scmp.eq.s32.totalorder %s2364_s23, 0  ;;  %p120_p2 = scmp.ne.s32.totalorder %s2348_s19, %s2344_s18 }
   0x8   : > { %p2444_p3 = scmp.eq.s32.totalorder %s1808_s24, 0  ;;  %p1809_p4 = scmp.ge.s32.totalorder %s2364_s23, 1 }
   0x9   : > { %p116_p5 = por %p115_p1, %p114_p0  ;;  %p183_p6 = scmp.lt.s32.totalorder %s2364_s23, 4 }
   0xa   : > { %s2705_s25 = scalar_select %p2444_p3, 1, 0 }
   0xb   : > { %p2452_p7 = por %p2444_p3, %p120_p2  ;;  %p2456_p8 = pnand %p1809_p4, %p183_p6 }
   0xc   : > { %s2366_s28 = smov [#allocation5]   ;;  %p2078_p11 = scmp.lt.s32.totalorder %s2364_s23, 3 }
   0xd   : > { %s2706_s26 = scalar_select %p2452_p7, 1, 0 }
   0xe   : > { %s2707_s27 = scalar_select %p2456_p8, 1, 0 }
   0xf   : > { %s202_s29 = sshll.u32 %s2366_s28, 4  ;;  %p2069_p9 = pneg %p2456_p8  ;;  %s203_s29 = int_to_ptr.vmem [resolvable:$true] %s202_s29 }
  0x10   : > { %s107_s6 = sadd.s32 1, %s2352_s20  ;;  %p2470_p12 = pnand %p2078_p11, %p116_p5 }
  0x11   : > { %p2464_p10 = pnand %p2069_p9, %p2444_p3  ;;  %s2222_s10 = scalar_lea.hbm %s2695_s1, 8192 }
  0x12   : > { %s2709_s7 = scalar_select %p2470_p12, 1, 0 }
  0x13   : > { %p2223_p13 = scmp.ne.s32.totalorder %s2695_s1, %s2222_s10  ;;  %p2224_p0 = pneg %p2464_p10 }
  0x14   : > { %p2229_p4 = scmp.lt.u32.totalorder %s2222_s10, %s2695_s1 }
  0x15   : > { %p2225_p1 = pnand %p2224_p0, %p2223_p13 }
  0x17   : > { %p2226_p2 = pneg %p2225_p1 }
  0x19   : > { %p2231_p5 = pnand %p2229_p4, %p2226_p2 }
  0x1b   : > { %2234 = shalt.err (!%p2231_p5)
}
  0x1c   : > { %s2235_s15 = scalar_lea.vmem %s203_s29, 8192  ;;  %p2243_p7 = scmp.lt.s32.totalorder %s203_s29, %s203_s29 }
  0x1d   : > { %p2236_p6 = scmp.ne.s32.totalorder %s203_s29, %s2235_s15  ;;  %p2244_p3 = scmp.lt.s32.totalorder %s2235_s15, %s2235_s15 }
  0x1f   : > { %p2238_p9 = pnand %p2236_p6, %p2224_p0  ;;  %p2245_p8 = por %p2244_p3, %p2243_p7 }
  0x21   : > { %p2239_p11 = pneg %p2238_p9 }
  0x23   : > { %p2246_p12 = pnand %p2245_p8, %p2239_p11 }
  0x25   : > { %2249 = shalt.err (!%p2246_p12)
}
  0x26   : > { %s2367_s16 = smov 512   ;;  %s2368_s17 = smov 32  }
  0x27   : > { %2072 = dma.hbm_to_vmem [thread:$0]  (!%p2464_p10), %s2695_s1, 8192, %s203_s29, [#allocation6], %s2367_s16, %s2367_s16, %s2368_s17  }
  0x28   : > { %s29_s8 = sadd.s32 1, %s2360_s22  ;;  %s219_s9 = sand.u32 1, %s2352_s20  }
  0x29   : > { %p30_p3 = scmp.ge.s32.totalorder %s29_s8, 3  ;;  %s1813_s10 = sshll.u32 %s219_s9, 9 }
  0x2a   : > { %s1814_s11 = sshll.u32 %s2360_s22, 6  ;;  %s223_s29 = scalar_lea.vmem [#allocation8], %s1813_s10 }
  0x2b   : > { %s2721_s8 = smov (%p30_p3, %s29_s8), 0  ;;  %s2498_s14 = scalar_lea.hbm %s2697_s3, %s1814_s11 }
  0x2c   : > { %s104_s30 = ssub.s32 %s2360_s22, %s2721_s8  ;;  %s229_s15 = sshll.u32 %s223_s29, 4  ;;  %s2502_s15 = int_to_ptr.vmem [resolvable:$true] %s229_s15 }
  0x2d   : > { %p105_p7 = scmp.eq.s32.totalorder %s104_s30, 0  ;;  %s2509_s17 = scalar_lea.sflag [#allocation9], %s219_s9 }
  0x2e   : > { %s2250_s18 = scalar_lea.hbm %s2498_s14, 8192  ;;  %p2710_p10 = scmp.ne.s32.totalorder %s2709_s7, 0 }
  0x2f   : > { %s2507_s16 = scalar_select %p105_p7, %s2352_s20, %s107_s6  }
  0x30   : > { %p2251_p8 = scmp.ne.s32.totalorder %s2498_s14, %s2250_s18  ;;  %p2252_p12 = pneg %p2710_p10 }
  0x31   : > { %s2255_s10 = scalar_lea.hbm %s2697_s3, 24576  ;;  %p2256_p1 = scmp.lt.u32.totalorder %s2498_s14, %s2697_s3 }
  0x32   : > { %p2253_p13 = pnand %p2252_p12, %p2251_p8  ;;  %p2257_p2 = scmp.lt.u32.totalorder %s2255_s10, %s2250_s18 }
  0x33   : > { %p2259_p5 = scmp.lt.u32.totalorder %s2250_s18, %s2498_s14 }
  0x34   : > { %p2254_p0 = pneg %p2253_p13  ;;  %p2258_p4 = por %p2257_p2, %p2256_p1 }
  0x36   : > { %p2260_p6 = por %p2259_p5, %p2258_p4 }
  0x38   : > { %p2261_p9 = pnand %p2260_p6, %p2254_p0 }
  0x3a   : > { %2264 = shalt.err (!%p2261_p9)
}
  0x3b   : > { %s2265_s6 = scalar_lea.vmem %s2502_s15, 8192  ;;  %s2369_s9 = smov [#allocation8]  }
  0x3c   : > { %p2266_p11 = scmp.ne.s32.totalorder %s2502_s15, %s2265_s6  ;;  %s2270_s30 = sshll.u32 %s2369_s9, 4  ;;  %s2271_s30 = int_to_ptr.vmem [resolvable:$false] %s2270_s30 }
  0x3d   : > { %s2272_s29 = scalar_lea.vmem %s2271_s30, 16384  ;;  %p2273_p8 = scmp.lt.s32.totalorder %s2502_s15, %s2271_s30 }
  0x3e   : > { %p2268_p3 = pnand %p2266_p11, %p2252_p12  ;;  %p2274_p13 = scmp.lt.s32.totalorder %s2272_s29, %s2265_s6 }
  0x40   : > { %p2269_p7 = pneg %p2268_p3  ;;  %p2275_p1 = por %p2274_p13, %p2273_p8 }
  0x42   : > { %p2276_p2 = pnand %p2275_p1, %p2269_p7 }
  0x44   : > { %2279 = shalt.err (!%p2276_p2)
}
  0x45   : > { %s2370_s18 = smov 192   ;;  %s2371_s28 = smov 64  }
  0x46   : > { %s2372_s11 = smov 4   ;;  %p2711_p12 = scmp.ne.s32.totalorder %s2707_s27, 0 }
  0x47   : > { %2076 = dma.hbm_to_vmem [thread:$0]  (!%p2710_p10), %s2498_s14, 8192, %s2502_s15, %s2509_s17, %s2370_s18, %s2371_s28, %s2372_s11  }
  0x48   : > { %247 = sbr.rel (%p2711_p12) target bundleno = 1270 (0x4f6), region = 40  ;;  %p2712_p0 = scmp.ne.s32.totalorder (!%p2711_p12), %s2705_s25, 0 }
  0x4f   : > { %2331 = dma.done.wait (%p2712_p0), [#allocation6], 8192  }
  0x50   : > { %2333 = vsyncadd (%p2712_p0), [#allocation6], 4294959104  ;;  %s253_s10 = sand.u32 1, %s2348_s19   ;;  %p2713_p4 = scmp.ne.s32.totalorder %s2706_s26, 0 }
  0x51   : > { %s1817_s12 = sshll.u32 %s253_s10, 9  ;;  %s254_s13 = scalar_lea.sflag [#allocation9], %s253_s10 }
  0x52   : > { %s2544_s6 = scalar_lea.vmem [#allocation8], %s1817_s12 }
  0x53   : > { %2335 = dma.done.wait (%p2713_p4), %s254_s13, 8192  }
  0x54   : > { %2337 = vsyncadd (%p2713_p4), %s254_s13, 4294959104  ;;  %p290_p10 = scmp.lt.s32.totalorder %s2356_s21, 2  ;;  %p1818_p5 = scmp.ne.s32.totalorder %s2356_s21, 0 }
  0x55   : > { %v299_v0 = vld [vmem:[#allocation5] sm:$0xff] (!%p1818_p5)  ;;  %v300_v2 = vld [vmem:[#allocation5 + $0x8] sm:$0xff] (!%p1818_p5)  ;;  %v2373_v8 = vmov (!%p1818_p5), 0   ;;  %v301_v63 = vld [vmem:[#allocation5 + $0x10] sm:$0xff] (!%p1818_p5)  ;;  %vm933_vm0 = vcmask (!%p1818_p5), 7168  }
  0x56   : > { %s2552_s27 = scalar_select %p290_p10, %s2356_s21, 2 }
  0x57   : > { %297 = sbr.rel (%p1818_p5) target bundleno = 374 (0x176), region = 52  ;;  %v303_v1 = vld [vmem:[#allocation5 + $0x20] sm:$0xff] (!%p1818_p5)  ;;  %v304_v4 = vld [vmem:[#allocation5 + $0x28] sm:$0xff] (!%p1818_p5)  ;;  %757 = vmatprep.mubr.bf16.mxu0 (!%p1818_p5), %v2373_v8  ;;  %798 = vmatprep.mubr.bf16.mxu1 (!%p1818_p5), %v2373_v8 }
  0x58   : > { %s292_s14 = scalar_lea.vmem %s2698_s4, %s2552_s27  ;;  %v1820_v3 = vcombine.high (!%p1818_p5), %v299_v0, %v303_v1  ;;  %v1819_v5 = vcombine.low (!%p1818_p5), %v299_v0, %v303_v1  ;;  %v307_v6 = vld [vmem:[#allocation5 + $0x40] sm:$0xff] (!%p1818_p5)  ;;  %v1822_v9 = vcombine.high (!%p1818_p5), %v300_v2, %v304_v4  ;;  %v1821_v10 = vcombine.low (!%p1818_p5), %v300_v2, %v304_v4  ;;  %v308_v12 = vld [vmem:[#allocation5 + $0x48] sm:$0xff] (!%p1818_p5)  ;;  %v305_v0 = vld [vmem:[#allocation5 + $0x30] sm:$0xff] (!%p1818_p5) }
  0x59   : > { %v311_v7 = vld [vmem:[#allocation5 + $0x60] sm:$0xff] (!%p1818_p5)  ;;  %v312_v13 = vld [vmem:[#allocation5 + $0x68] sm:$0xff] (!%p1818_p5)  ;;  %v302_v1 = vld [vmem:[#allocation5 + $0x18] sm:$0xff] (!%p1818_p5) }
  0x5a   : > { %v1828_v11 = vcombine.high (!%p1818_p5), %v307_v6, %v311_v7  ;;  %v315_v14 = vld [vmem:[#allocation5 + $0x80] sm:$0xff] (!%p1818_p5)  ;;  %725 = vmatprep.subr.bf16.mxu0 (!%p1818_p5), %v1820_v3  ;;  %v1830_v15 = vcombine.high (!%p1818_p5), %v308_v12, %v312_v13  ;;  %v316_v17 = vld [vmem:[#allocation5 + $0x88] sm:$0xff] (!%p1818_p5)  ;;  %766 = vmatprep.subr.bf16.mxu1 (!%p1818_p5), %v1822_v9  ;;  %v1827_v19 = vcombine.low (!%p1818_p5), %v307_v6, %v311_v7  ;;  %v306_v2 = vld [vmem:[#allocation5 + $0x38] sm:$0xff] (!%p1818_p5) }
  0x5b   : > { %v319_v16 = vld [vmem:[#allocation5 + $0xa0] sm:$0xff] (!%p1818_p5)  ;;  %v320_v18 = vld [vmem:[#allocation5 + $0xa8] sm:$0xff] (!%p1818_p5)  ;;  %726 = vmatpush1.bf16.msra.mxu0 (!%p1818_p5), %v1819_v5  ;;  %767 = vmatpush1.bf16.msra.mxu1 (!%p1818_p5), %v1821_v10  ;;  %v1829_v20 = vcombine.low (!%p1818_p5), %v308_v12, %v312_v13  ;;  %v1824_v5 = vcombine.high (!%p1818_p5), %v301_v63, %v305_v0  ;;  %v1826_v6 = vcombine.high (!%p1818_p5), %v302_v1, %v306_v2  ;;  %v309_v7 = vld [vmem:[#allocation5 + $0x50] sm:$0xff] (!%p1818_p5) }
  0x5c   : > { %727 = vmatprep.subr.bf16.mxu0 (!%p1818_p5), %v1828_v11  ;;  %v1836_v21 = vcombine.high (!%p1818_p5), %v315_v14, %v319_v16  ;;  %768 = vmatprep.subr.bf16.mxu1 (!%p1818_p5), %v1830_v15  ;;  %v1838_v22 = vcombine.high (!%p1818_p5), %v316_v17, %v320_v18  ;;  %v323_v23 = vld [vmem:[#allocation5 + $0xc0] sm:$0xff] (!%p1818_p5)  ;;  %v324_v25 = vld [vmem:[#allocation5 + $0xc8] sm:$0xff] (!%p1818_p5)  ;;  %v1835_v27 = vcombine.low (!%p1818_p5), %v315_v14, %v319_v16  ;;  %v313_v9 = vld [vmem:[#allocation5 + $0x70] sm:$0xff] (!%p1818_p5) }
  0x5d   : > { %v327_v24 = vld [vmem:[#allocation5 + $0xe0] sm:$0xff] (!%p1818_p5)  ;;  %v328_v26 = vld [vmem:[#allocation5 + $0xe8] sm:$0xff] (!%p1818_p5)  ;;  %v1837_v28 = vcombine.low (!%p1818_p5), %v316_v17, %v320_v18  ;;  %v310_v10 = vld [vmem:[#allocation5 + $0x58] sm:$0xff] (!%p1818_p5)  ;;  %v1823_v13 = vcombine.low (!%p1818_p5), %v301_v63, %v305_v0  ;;  %v1825_v14 = vcombine.low (!%p1818_p5), %v302_v1, %v306_v2  ;;  %v1832_v15 = vcombine.high (!%p1818_p5), %v309_v7, %v313_v9 }
  0x5e   : > { %v1844_v29 = vcombine.high %v323_v23, %v327_v24  ;;  %v1846_v30 = vcombine.high %v324_v25, %v328_v26  ;;  %v331_v31 = vld [vmem:[#allocation5 + $0x100] sm:$0xff]  ;;  %v332_v33 = vld [vmem:[#allocation5 + $0x108] sm:$0xff]  ;;  %v1843_v35 = vcombine.low %v323_v23, %v327_v24  ;;  %v1845_v36 = vcombine.low %v324_v25, %v328_v26  ;;  %v314_v11 = vld [vmem:[#allocation5 + $0x78] sm:$0xff] }
  0x5f   : > { %728 = vmatpush1.bf16.msra.mxu0 %v1827_v19  ;;  %769 = vmatpush1.bf16.msra.mxu1 %v1829_v20  ;;  %v335_v32 = vld [vmem:[#allocation5 + $0x120] sm:$0xff]  ;;  %v336_v34 = vld [vmem:[#allocation5 + $0x128] sm:$0xff]  ;;  %v2564_v12 = vld [vmem:[%s2694_s0] sm:$0xf]  ;;  %v1834_v16 = vcombine.high %v310_v10, %v314_v11  ;;  %v2374_v2 = vmov -1e+30  }
  0x60   : > { %729 = vmatprep.subr.bf16.mxu0 %v1836_v21  ;;  %770 = vmatprep.subr.bf16.mxu1 %v1838_v22  ;;  %v1852_v37 = vcombine.high %v331_v31, %v335_v32  ;;  %v1854_v38 = vcombine.high %v332_v33, %v336_v34  ;;  %v339_v39 = vld [vmem:[#allocation5 + $0x140] sm:$0xff]  ;;  %v340_v41 = vld [vmem:[#allocation5 + $0x148] sm:$0xff]  ;;  %v1851_v43 = vcombine.low %v331_v31, %v335_v32  ;;  %v317_v17 = vld [vmem:[#allocation5 + $0x90] sm:$0xff] }
  0x61   : > { %v343_v40 = vld [vmem:[#allocation5 + $0x160] sm:$0xff]  ;;  %v344_v42 = vld [vmem:[#allocation5 + $0x168] sm:$0xff]  ;;  %v1853_v44 = vcombine.low %v332_v33, %v336_v34  ;;  %v321_v18 = vld [vmem:[#allocation5 + $0xb0] sm:$0xff]  ;;  %v1831_v21 = vcombine.low %v309_v7, %v313_v9  ;;  %v1833_v22 = vcombine.low %v310_v10, %v314_v11  ;;  %934 = vst.msk [vmem:[#allocation3] sm:$0xff] %vm933_vm0, %v2374_v2 }
  0x62   : > { %v1860_v45 = vcombine.high %v339_v39, %v343_v40  ;;  %v1862_v46 = vcombine.high %v340_v41, %v344_v42  ;;  %v347_v47 = vld [vmem:[#allocation5 + $0x180] sm:$0xff]  ;;  %v348_v49 = vld [vmem:[#allocation5 + $0x188] sm:$0xff]  ;;  %v1859_v51 = vcombine.low %v339_v39, %v343_v40  ;;  %v1861_v52 = vcombine.low %v340_v41, %v344_v42  ;;  %v318_v19 = vld [vmem:[#allocation5 + $0x98] sm:$0xff] }
  0x63   : > { %730 = vmatpush1.bf16.msra.mxu0 %v1835_v27  ;;  %771 = vmatpush1.bf16.msra.mxu1 %v1837_v28  ;;  %v351_v48 = vld [vmem:[#allocation5 + $0x1a0] sm:$0xff]  ;;  %v352_v50 = vld [vmem:[#allocation5 + $0x1a8] sm:$0xff]  ;;  %v322_v20 = vld [vmem:[#allocation5 + $0xb8] sm:$0xff]  ;;  %v1840_v23 = vcombine.high %v317_v17, %v321_v18 }
  0x64   : > { %731 = vmatprep.subr.bf16.mxu0 %v1844_v29  ;;  %772 = vmatprep.subr.bf16.mxu1 %v1846_v30  ;;  %v1868_v53 = vcombine.high %v347_v47, %v351_v48  ;;  %v1870_v54 = vcombine.high %v348_v49, %v352_v50  ;;  %v355_v55 = vld [vmem:[#allocation5 + $0x1c0] sm:$0xff]  ;;  %v356_v57 = vld [vmem:[#allocation5 + $0x1c8] sm:$0xff]  ;;  %v1867_v59 = vcombine.low %v347_v47, %v351_v48  ;;  %v325_v25 = vld [vmem:[#allocation5 + $0xd0] sm:$0xff] }
  0x65   : > { %v359_v56 = vld [vmem:[#allocation5 + $0x1e0] sm:$0xff]  ;;  %v360_v58 = vld [vmem:[#allocation5 + $0x1e8] sm:$0xff]  ;;  %v1869_v60 = vcombine.low %v348_v49, %v352_v50  ;;  %v1842_v24 = vcombine.high %v318_v19, %v322_v20  ;;  %v329_v26 = vld [vmem:[#allocation5 + $0xf0] sm:$0xff]  ;;  %v1839_v29 = vcombine.low %v317_v17, %v321_v18  ;;  %v1841_v30 = vcombine.low %v318_v19, %v322_v20 }
  0x66   : > { %v1876_v61 = vcombine.high %v355_v55, %v359_v56  ;;  %v1878_v62 = vcombine.high %v356_v57, %v360_v58  ;;  %v1875_v3 = vcombine.low %v355_v55, %v359_v56  ;;  %v1877_v4 = vcombine.low %v356_v57, %v360_v58  ;;  %v326_v27 = vld [vmem:[#allocation5 + $0xd8] sm:$0xff]  ;;  %v333_v33 = vld [vmem:[#allocation5 + $0x110] sm:$0xff] }
  0x67   : > { %732 = vmatpush1.bf16.msra.mxu0 %v1843_v35  ;;  %773 = vmatpush1.bf16.msra.mxu1 %v1845_v36  ;;  %v330_v28 = vld [vmem:[#allocation5 + $0xf8] sm:$0xff]  ;;  %v1848_v31 = vcombine.high %v325_v25, %v329_v26  ;;  %v337_v34 = vld [vmem:[#allocation5 + $0x130] sm:$0xff] }
  0x68   : > { %733 = vmatprep.subr.bf16.mxu0 %v1852_v37  ;;  %774 = vmatprep.subr.bf16.mxu1 %v1854_v38  ;;  %v1850_v32 = vcombine.high %v326_v27, %v330_v28  ;;  %v334_v35 = vld [vmem:[#allocation5 + $0x118] sm:$0xff]  ;;  %v1847_v37 = vcombine.low %v325_v25, %v329_v26  ;;  %v1849_v38 = vcombine.low %v326_v27, %v330_v28  ;;  %v341_v40 = vld [vmem:[#allocation5 + $0x150] sm:$0xff] }
  0x69   : > { %v338_v36 = vld [vmem:[#allocation5 + $0x138] sm:$0xff]  ;;  %v1856_v39 = vcombine.high %v333_v33, %v337_v34  ;;  %v345_v41 = vld [vmem:[#allocation5 + $0x170] sm:$0xff] }
  0x6a   : > { %v342_v42 = vld [vmem:[#allocation5 + $0x158] sm:$0xff]  ;;  %v349_v48 = vld [vmem:[#allocation5 + $0x190] sm:$0xff] }
  0x6b   : > { %734 = vmatpush1.bf16.msra.mxu0 %v1851_v43  ;;  %775 = vmatpush1.bf16.msra.mxu1 %v1853_v44  ;;  %v346_v43 = vld [vmem:[#allocation5 + $0x178] sm:$0xff]  ;;  %v1855_v44 = vcombine.low %v333_v33, %v337_v34  ;;  %v353_v49 = vld [vmem:[#allocation5 + $0x1b0] sm:$0xff] }
  0x6c   : > { %735 = vmatprep.subr.bf16.mxu0 %v1860_v45  ;;  %776 = vmatprep.subr.bf16.mxu1 %v1862_v46  ;;  %v1857_v45 = vcombine.low %v334_v35, %v338_v36  ;;  %v1864_v46 = vcombine.high %v341_v40, %v345_v41  ;;  %v1866_v47 = vcombine.high %v342_v42, %v346_v43  ;;  %v350_v50 = vld [vmem:[#allocation5 + $0x198] sm:$0xff]  ;;  %v357_v56 = vld [vmem:[#allocation5 + $0x1d0] sm:$0xff] }
  0x6d   : > { %v361_v57 = vld [vmem:[#allocation5 + $0x1f0] sm:$0xff]  ;;  %v358_v58 = vld [vmem:[#allocation5 + $0x1d8] sm:$0xff] }
  0x6e   : > { %v1879_v0 = vcombine.low %v357_v56, %v361_v57  ;;  %v363_v7 = vld [vmem:[%s2696_s2] sm:$0xff] }
  0x6f   : > { %736 = vmatpush1.bf16.msra.mxu0 %v1859_v51  ;;  %777 = vmatpush1.bf16.msra.mxu1 %v1861_v52  ;;  %v354_v51 = vld [vmem:[#allocation5 + $0x1b8] sm:$0xff]  ;;  %v1863_v52 = vcombine.low %v341_v40, %v345_v41 }
  0x70   : > { %737 = vmatprep.subr.bf16.mxu0 %v1868_v53  ;;  %778 = vmatprep.subr.bf16.mxu1 %v1870_v54  ;;  %v1865_v53 = vcombine.low %v342_v42, %v346_v43  ;;  %v1872_v54 = vcombine.high %v349_v48, %v353_v49  ;;  %v1874_v55 = vcombine.high %v350_v50, %v354_v51 }
  0x73   : > { %738 = vmatpush1.bf16.msra.mxu0 %v1867_v59  ;;  %779 = vmatpush1.bf16.msra.mxu1 %v1869_v60  ;;  %v362_v59 = vld [vmem:[#allocation5 + $0x1f8] sm:$0xff]  ;;  %v1871_v60 = vcombine.low %v349_v48, %v353_v49 }
  0x74   : > { %739 = vmatprep.subr.bf16.mxu0 %v1876_v61  ;;  %780 = vmatprep.subr.bf16.mxu1 %v1878_v62  ;;  %v1873_v61 = vcombine.low %v350_v50, %v354_v51  ;;  %v1880_v62 = vcombine.high %v357_v56, %v361_v57  ;;  %v1882_v63 = vcombine.high %v358_v58, %v362_v59 }
  0x75   : > { %v1881_v1 = vcombine.low %v358_v58, %v362_v59 }
  0x77   : > { %740 = vmatpush1.bf16.msra.mxu0 %v1875_v3  ;;  %781 = vmatpush1.bf16.msra.mxu1 %v1877_v4  ;;  %v2375_v3 = vmov 0.0   ;;  %v365_v4 = vlaneseq }
  0x78   : > { %807 = vmatprep.subr.bf16.mxu0 %v1824_v5  ;;  %848 = vmatprep.subr.bf16.mxu1 %v1826_v6  ;;  %935 = vst.msk [vmem:[#allocation4] sm:$0xff] %vm933_vm0, %v2375_v3 }
  0x79   : > { %v366_v5 = vshrl.u32 %v365_v4, 7 }
  0x7a   : > { %758 = vmatmul.mubr.bf16.vlgmr.msra.gmra.mrb[0].mxu0 %v2564_v12  ;;  %799 = vmatmul.mubr.bf16.vlgmr.msra.gmra.mrb[0].mxu1 %v2564_v12 }
  0x7b   : > { %808 = vmatpush1.bf16.msra.mxu0 %v1823_v13  ;;  %849 = vmatpush1.bf16.msra.mxu1 %v1825_v14  ;;  %v367_v6 = vsub.s32 0, %v366_v5  ;;  %v375_v9 = vsub.s32 2, %v366_v5  ;;  %v371_v10 = vsub.s32 1, %v366_v5  ;;  %v379_v11 = vsub.s32 3, %v366_v5 }
  0x7c   : > { %809 = vmatprep.subr.bf16.mxu0 %v1832_v15  ;;  %850 = vmatprep.subr.bf16.mxu1 %v1834_v16  ;;  %v383_v34 = vsub.s32 4, %v366_v5 }
  0x7d   : > { %839 = vmatprep.mubr.bf16.mxu0 %v2373_v8  ;;  %880 = vmatprep.mubr.bf16.mxu1 %v2373_v8  ;;  %v1858_v8 = vcombine.high %v334_v35, %v338_v36  ;;  %v368_v13 = vrot.slane %v363_v7, %v367_v6  ;;  %v376_v14 = vrot.slane %v363_v7, %v375_v9  ;;  %v391_v35 = vsub.s32 6, %v366_v5 }
  0x7e   : > { %v372_v15 = vrot.slane %v363_v7, %v371_v10  ;;  %v380_v16 = vrot.slane %v363_v7, %v379_v11  ;;  %v387_v36 = vsub.s32 5, %v366_v5 }
  0x7f   : > { %810 = vmatpush1.bf16.msra.mxu0 %v1831_v21  ;;  %851 = vmatpush1.bf16.msra.mxu1 %v1833_v22 }
  0x80   : > { %811 = vmatprep.subr.bf16.mxu0 %v1840_v23  ;;  %852 = vmatprep.subr.bf16.mxu1 %v1842_v24 }
  0x83   : > { %812 = vmatpush1.bf16.msra.mxu0 %v1839_v29  ;;  %853 = vmatpush1.bf16.msra.mxu1 %v1841_v30 }
  0x84   : > { %813 = vmatprep.subr.bf16.mxu0 %v1848_v31  ;;  %854 = vmatprep.subr.bf16.mxu1 %v1850_v32 }
  0x87   : > { %814 = vmatpush1.bf16.msra.mxu0 %v1847_v37  ;;  %855 = vmatpush1.bf16.msra.mxu1 %v1849_v38  ;;  %v395_v37 = vsub.s32 7, %v366_v5  ;;  %v384_v38 = vrot.slane %v363_v7, %v383_v34 }
  0x88   : > { %815 = vmatprep.subr.bf16.mxu0 %v1856_v39  ;;  %856 = vmatprep.subr.bf16.mxu1 %v1858_v8  ;;  %v392_v39 = vrot.slane %v363_v7, %v391_v35  ;;  %v388_v8 = vrot.slane %v363_v7, %v387_v36 }
  0x89   : > { %v396_v40 = vrot.slane %v363_v7, %v395_v37 }
  0x8b   : > { %816 = vmatpush1.bf16.msra.mxu0 %v1855_v44  ;;  %857 = vmatpush1.bf16.msra.mxu1 %v1857_v45 }
  0x8c   : > { %817 = vmatprep.subr.bf16.mxu0 %v1864_v46  ;;  %858 = vmatprep.subr.bf16.mxu1 %v1866_v47 }
  0x8f   : > { %818 = vmatpush1.bf16.msra.mxu0 %v1863_v52  ;;  %859 = vmatpush1.bf16.msra.mxu1 %v1865_v53 }
  0x90   : > { %819 = vmatprep.subr.bf16.mxu0 %v1872_v54  ;;  %860 = vmatprep.subr.bf16.mxu1 %v1874_v55 }
  0x93   : > { %820 = vmatpush1.bf16.msra.mxu0 %v1871_v60  ;;  %861 = vmatpush1.bf16.msra.mxu1 %v1873_v61 }
  0x94   : > { %821 = vmatprep.subr.bf16.mxu0 %v1880_v62  ;;  %862 = vmatprep.subr.bf16.mxu1 %v1882_v63 }
  0x97   : > { %822 = vmatpush1.bf16.msra.mxu0 %v1879_v0  ;;  %863 = vmatpush1.bf16.msra.mxu1 %v1881_v1 }
  0x9a   : > { %840 = vmatmul.mubr.bf16.vlgmr.msra.gmra.mrb[4].mxu0 %v2564_v12  ;;  %881 = vmatmul.mubr.bf16.vlgmr.msra.gmra.mrb[4].mxu1 %v2564_v12 }
 0x14d   : > { %v759_v12 = vpop.f32.mrb[0].mxu0  ;;  %v800_v18 = vpop.f32.mrb[0].mxu1 }
 0x14e   : > { %v760_v17 = vadd.f32 %v759_v12, %v368_v13  ;;  %v761_v19 = vpop.f32.mrb[1].mxu0  ;;  %v801_v20 = vadd.f32 %v800_v18, %v376_v14  ;;  %v802_v22 = vpop.f32.mrb[1].mxu1 }
 0x14f   : > { %v762_v21 = vadd.f32 %v761_v19, %v372_v15  ;;  %v763_v23 = vpop.f32.mrb[2].mxu0  ;;  %v803_v25 = vadd.f32 %v802_v22, %v380_v16  ;;  %v804_v26 = vpop.f32.mrb[2].mxu1 }
 0x150   : > { %v889_v24 = vmax.f32 %v760_v17, 0.0  ;;  %v764_v27 = vpop.f32.mrb[3].mxu0  ;;  %v891_v28 = vmax.f32 %v801_v20, 0.0  ;;  %v805_v30 = vpop.f32.mrb[3].mxu1 }
 0x151   : > { %v890_v29 = vmax.f32 %v762_v21, 0.0  ;;  %v892_v31 = vmax.f32 %v803_v25, 0.0 }
 0x153   : > { %v1967_v32 = vpack.c.bf16 %v890_v29, %v889_v24  ;;  %v1968_v33 = vpack.c.bf16 %v892_v31, %v891_v28 }
 0x155   : > { %929 = vst [vmem:[#allocation2] sm:$0xff] %v1967_v32  ;;  %930 = vst [vmem:[#allocation2 + $0x8] sm:$0xff] %v1968_v33 }
 0x16d   : > { %v841_v41 = vpop.f32.mrb[4].mxu0  ;;  %v882_v43 = vpop.f32.mrb[4].mxu1 }
 0x16e   : > { %v842_v42 = vadd.f32 %v841_v41, %v384_v38  ;;  %v843_v44 = vpop.f32.mrb[5].mxu0  ;;  %v883_v45 = vadd.f32 %v882_v43, %v392_v39  ;;  %v884_v47 = vpop.f32.mrb[5].mxu1 }
 0x16f   : > { %v844_v46 = vadd.f32 %v843_v44, %v388_v8  ;;  %v845_v48 = vpop.f32.mrb[6].mxu0  ;;  %v885_v50 = vadd.f32 %v884_v47, %v396_v40  ;;  %v886_v51 = vpop.f32.mrb[6].mxu1 }
 0x170   : > { %v893_v49 = vmax.f32 %v842_v42, 0.0  ;;  %v846_v52 = vpop.f32.mrb[7].mxu0  ;;  %v895_v53 = vmax.f32 %v883_v45, 0.0  ;;  %v887_v55 = vpop.f32.mrb[7].mxu1 }
 0x171   : > { %v894_v54 = vmax.f32 %v844_v46, 0.0  ;;  %v896_v56 = vmax.f32 %v885_v50, 0.0 }
 0x173   : > { %v1969_v57 = vpack.c.bf16 %v894_v54, %v893_v49  ;;  %v1970_v58 = vpack.c.bf16 %v896_v56, %v895_v53 }
 0x175   : > { %931 = vst [vmem:[#allocation2 + $0x10] sm:$0xff] %v1969_v57  ;;  %932 = vst [vmem:[#allocation2 + $0x18] sm:$0xff] %v1970_v58 }
 0x176 PF: > { %v2143_v59 = vld [vmem:[%s2544_s6 + $0x40] sm:$0xff]   ;;  %v2147_v63 = vld [vmem:[%s2544_s6 + $0x48] sm:$0xff]   ;;  %v2151_v3 = vld [vmem:[%s2544_s6 + $0x50] sm:$0xff]   ;;  %s1960_s18 = sshll.u32 %s2356_s21, 7  ;;  %vm1667_vm1 = vcmask 7168   ;;  %p1962_p6 = scmp.ne.s32.totalorder %s2356_s21, 2 }
 0x177   : > { %v2144_v60 = vld [vmem:[%s2544_s6 + $0xc0] sm:$0xff]   ;;  %1971 = vmatprep.subr.bf16.mxu0 %v2143_v59  ;;  %v2148_v0 = vld [vmem:[%s2544_s6 + $0xc8] sm:$0xff]   ;;  %v2152_v4 = vld [vmem:[%s2544_s6 + $0xd0] sm:$0xff]   ;;  %s1671_s28 = sshra.s32 %s1960_s18, 7 }
 0x178   : > { %v2145_v61 = vld [vmem:[%s2544_s6] sm:$0xff]   ;;  %1993 = vmatprep.subr.bf16.mxu1 %v2144_v60  ;;  %v2149_v1 = vld [vmem:[%s2544_s6 + $0x8] sm:$0xff]   ;;  %v2153_v5 = vld [vmem:[%s2544_s6 + $0x10] sm:$0xff]   ;;  %s1961_s11 = sshll.u32 %s1671_s28, 3 }
 0x179   : > { %v2146_v62 = vld [vmem:[%s2544_s6 + $0x80] sm:$0xff]   ;;  %1972 = vmatpush3.bf16.msra.mxu0 %v2145_v61  ;;  %v2150_v2 = vld [vmem:[%s2544_s6 + $0x88] sm:$0xff]   ;;  %v2154_v6 = vld [vmem:[%s2544_s6 + $0x90] sm:$0xff]   ;;  %s1674_s10 = scalar_lea.vmem [#allocation10], %s1961_s11 }
 0x17a   : > { %1994 = vmatpush3.bf16.msra.mxu1 %v2146_v62  ;;  %1973 = vmatprep.subr.bf16.mxu0 %v2147_v63  ;;  %v2155_v7 = vld [vmem:[%s2544_s6 + $0x58] sm:$0xff]   ;;  %v2159_v13 = vld [vmem:[%s2544_s6 + $0x60] sm:$0xff]   ;;  %v2163_v12 = vld [vmem:[%s2544_s6 + $0x68] sm:$0xff]  }
 0x17b   : > { %1995 = vmatprep.subr.bf16.mxu1 %v2148_v0  ;;  %v2156_v9 = vld [vmem:[%s2544_s6 + $0xd8] sm:$0xff]   ;;  %v2160_v14 = vld [vmem:[%s2544_s6 + $0xe0] sm:$0xff]   ;;  %v2164_v17 = vld [vmem:[%s2544_s6 + $0xe8] sm:$0xff]  }
 0x17c   : > { %v2157_v10 = vld [vmem:[%s2544_s6 + $0x18] sm:$0xff]   ;;  %v2161_v15 = vld [vmem:[%s2544_s6 + $0x20] sm:$0xff]   ;;  %v2165_v18 = vld [vmem:[%s2544_s6 + $0x28] sm:$0xff]  }
 0x17d   : > { %1974 = vmatpush3.bf16.msra.mxu0 %v2149_v1  ;;  %v2158_v11 = vld [vmem:[%s2544_s6 + $0x98] sm:$0xff]   ;;  %v2162_v16 = vld [vmem:[%s2544_s6 + $0xa0] sm:$0xff]   ;;  %v2166_v19 = vld [vmem:[%s2544_s6 + $0xa8] sm:$0xff]  }
 0x17e   : > { %1996 = vmatpush3.bf16.msra.mxu1 %v2150_v2  ;;  %1975 = vmatprep.subr.bf16.mxu0 %v2151_v3  ;;  %v2167_v20 = vld [vmem:[%s2544_s6 + $0x70] sm:$0xff]   ;;  %v2171_v24 = vld [vmem:[%s2544_s6 + $0x78] sm:$0xff]   ;;  %v2179_v34 = vld [vmem:[%s2544_s6 + $0x140] sm:$0xff]  }
 0x17f   : > { %1997 = vmatprep.subr.bf16.mxu1 %v2152_v4  ;;  %v2168_v21 = vld [vmem:[%s2544_s6 + $0xf0] sm:$0xff]   ;;  %v2172_v25 = vld [vmem:[%s2544_s6 + $0xf8] sm:$0xff]   ;;  %v2180_v35 = vld [vmem:[%s2544_s6 + $0x1c0] sm:$0xff]  }
 0x180   : > { %v2169_v22 = vld [vmem:[%s2544_s6 + $0x30] sm:$0xff]   ;;  %v2173_v26 = vld [vmem:[%s2544_s6 + $0x38] sm:$0xff]   ;;  %v2181_v36 = vld [vmem:[%s2544_s6 + $0x100] sm:$0xff]  }
 0x181   : > { %1976 = vmatpush3.bf16.msra.mxu0 %v2153_v5  ;;  %v2170_v23 = vld [vmem:[%s2544_s6 + $0xb0] sm:$0xff]   ;;  %v2174_v27 = vld [vmem:[%s2544_s6 + $0xb8] sm:$0xff]   ;;  %v2182_v37 = vld [vmem:[%s2544_s6 + $0x180] sm:$0xff]  }
 0x182   : > { %1998 = vmatpush3.bf16.msra.mxu1 %v2154_v6  ;;  %1977 = vmatprep.subr.bf16.mxu0 %v2155_v7  ;;  %v936_v28 = vld [vmem:[#allocation2] sm:$0xff]  ;;  %v937_v29 = vld [vmem:[#allocation2 + $0x8] sm:$0xff]  ;;  %v2183_v38 = vld [vmem:[%s2544_s6 + $0x148] sm:$0xff]  }
 0x183   : > { %1999 = vmatprep.subr.bf16.mxu1 %v2156_v9  ;;  %v1888_v30 = vcombine.low %v936_v28, %v936_v28  ;;  %v1889_v31 = vcombine.high %v936_v28, %v936_v28  ;;  %v1890_v32 = vcombine.low %v937_v29, %v937_v29  ;;  %v1891_v33 = vcombine.high %v937_v29, %v937_v29  ;;  %v2184_v39 = vld [vmem:[%s2544_s6 + $0x1c8] sm:$0xff]   ;;  %v2187_v41 = vld [vmem:[%s2544_s6 + $0x150] sm:$0xff]   ;;  %v2191_v45 = vld [vmem:[%s2544_s6 + $0x158] sm:$0xff]  }
 0x184   : > { %v2185_v8 = vld [vmem:[%s2544_s6 + $0x108] sm:$0xff]   ;;  %v2188_v42 = vld [vmem:[%s2544_s6 + $0x1d0] sm:$0xff]   ;;  %v2192_v46 = vld [vmem:[%s2544_s6 + $0x1d8] sm:$0xff]  }
 0x185   : > { %1978 = vmatpush3.bf16.msra.mxu0 %v2157_v10  ;;  %1519 = vmatprep.mubr.bf16.mxu0 %v1889_v31  ;;  %v2186_v40 = vld [vmem:[%s2544_s6 + $0x188] sm:$0xff]   ;;  %v2189_v43 = vld [vmem:[%s2544_s6 + $0x110] sm:$0xff]   ;;  %v2193_v47 = vld [vmem:[%s2544_s6 + $0x118] sm:$0xff]  }
 0x186   : > { %2000 = vmatpush3.bf16.msra.mxu1 %v2158_v11  ;;  %1979 = vmatprep.subr.bf16.mxu0 %v2159_v13  ;;  %v2190_v44 = vld [vmem:[%s2544_s6 + $0x190] sm:$0xff]   ;;  %v2194_v48 = vld [vmem:[%s2544_s6 + $0x198] sm:$0xff]   ;;  %v2195_v49 = vld [vmem:[%s2544_s6 + $0x160] sm:$0xff]  }
 0x187   : > { %2001 = vmatprep.subr.bf16.mxu1 %v2160_v14  ;;  %1559 = vmatprep.mubr.bf16.mxu1 %v1891_v33  ;;  %v2196_v50 = vld [vmem:[%s2544_s6 + $0x1e0] sm:$0xff]   ;;  %v2199_v53 = vld [vmem:[%s2544_s6 + $0x168] sm:$0xff]   ;;  %v2203_v57 = vld [vmem:[%s2544_s6 + $0x170] sm:$0xff]   ;;  %v2376_v33 = vmov 0  }
 0x188   : > { %v2197_v51 = vld [vmem:[%s2544_s6 + $0x120] sm:$0xff]   ;;  %v2200_v54 = vld [vmem:[%s2544_s6 + $0x1e8] sm:$0xff]   ;;  %v2204_v58 = vld [vmem:[%s2544_s6 + $0x1f0] sm:$0xff]   ;;  %2142 = vset.pattern.permute.xlu0 %v2376_v33 }
 0x189   : > { %1980 = vmatpush3.bf16.msra.mxu0 %v2161_v15  ;;  %v2198_v52 = vld [vmem:[%s2544_s6 + $0x1a0] sm:$0xff]   ;;  %v2201_v55 = vld [vmem:[%s2544_s6 + $0x128] sm:$0xff]   ;;  %v2205_v59 = vld [vmem:[%s2544_s6 + $0x130] sm:$0xff]  }
 0x18a   : > { %2002 = vmatpush3.bf16.msra.mxu1 %v2162_v16  ;;  %1981 = vmatprep.subr.bf16.mxu0 %v2163_v12  ;;  %v2202_v56 = vld [vmem:[%s2544_s6 + $0x1a8] sm:$0xff]   ;;  %v2206_v60 = vld [vmem:[%s2544_s6 + $0x1b0] sm:$0xff]   ;;  %v2207_v61 = vld [vmem:[%s2544_s6 + $0x178] sm:$0xff]  }
 0x18b   : > { %2003 = vmatprep.subr.bf16.mxu1 %v2164_v17  ;;  %v2208_v62 = vld [vmem:[%s2544_s6 + $0x1f8] sm:$0xff]   ;;  %v938_v1 = vld [vmem:[#allocation2 + $0x10] sm:$0xff]  ;;  %v939_v4 = vld [vmem:[#allocation2 + $0x18] sm:$0xff] }
 0x18c   : > { %v2209_v63 = vld [vmem:[%s2544_s6 + $0x138] sm:$0xff]   ;;  %v1892_v2 = vcombine.low %v938_v1, %v938_v1  ;;  %v1893_v3 = vcombine.high %v938_v1, %v938_v1  ;;  %v1894_v5 = vcombine.low %v939_v4, %v939_v4  ;;  %v1895_v6 = vcombine.high %v939_v4, %v939_v4  ;;  %v1887_v10 = vld [vmem:[%s292_s14] ss:$0 sm:$0xff] }
 0x18d   : > { %1982 = vmatpush3.bf16.msra.mxu0 %v2165_v18  ;;  %v2210_v0 = vld [vmem:[%s2544_s6 + $0x1b8] sm:$0xff]  }
 0x18e   : > { %2004 = vmatpush3.bf16.msra.mxu1 %v2166_v19  ;;  %1983 = vmatprep.subr.bf16.mxu0 %v2167_v20 }
 0x18f   : > { %2005 = vmatprep.subr.bf16.mxu1 %v2168_v21 }
 0x191   : > { %1984 = vmatpush3.bf16.msra.mxu0 %v2169_v22 }
 0x192   : > { %2006 = vmatpush3.bf16.msra.mxu1 %v2170_v23  ;;  %1985 = vmatprep.subr.bf16.mxu0 %v2171_v24 }
 0x193   : > { %2007 = vmatprep.subr.bf16.mxu1 %v2172_v25 }
 0x195   : > { %1986 = vmatpush3.bf16.msra.mxu0 %v2173_v26 }
 0x196   : > { %2008 = vmatpush3.bf16.msra.mxu1 %v2174_v27  ;;  %2015 = vmatprep.subr.bf16.mxu0 %v2179_v34  ;;  %v1647_v34 = vld [vmem:[#allocation3] sm:$0xff] }
 0x197   : > { %2037 = vmatprep.subr.bf16.mxu1 %v2180_v35 }
 0x198   : > { %1520 = vmatmul.mubr.bf16.vlgmr.msra.gmra.mrb[0].mxu0 %v1888_v30 }
 0x199   : > { %1560 = vmatmul.mubr.bf16.vlgmr.msra.gmra.mrb[0].mxu1 %v1890_v32  ;;  %2016 = vmatpush3.bf16.msra.mxu0 %v2181_v36 }
 0x19a   : > { %2038 = vmatpush3.bf16.msra.mxu1 %v2182_v37  ;;  %2017 = vmatprep.subr.bf16.mxu0 %v2183_v38 }
 0x19b   : > { %2039 = vmatprep.subr.bf16.mxu1 %v2184_v39  ;;  %1599 = vmatprep.mubr.bf16.mxu0 %v1893_v3 }
 0x19c   : > { %1639 = vmatprep.mubr.bf16.mxu1 %v1895_v6 }
 0x19d   : > { %2018 = vmatpush3.bf16.msra.mxu0 %v2185_v8 }
 0x19e   : > { %2040 = vmatpush3.bf16.msra.mxu1 %v2186_v40  ;;  %2019 = vmatprep.subr.bf16.mxu0 %v2187_v41 }
 0x19f   : > { %2041 = vmatprep.subr.bf16.mxu1 %v2188_v42 }
 0x1a1   : > { %2020 = vmatpush3.bf16.msra.mxu0 %v2189_v43  ;;  %v1651_v43 = vld [vmem:[#allocation4] sm:$0xff] }
 0x1a2   : > { %2042 = vmatpush3.bf16.msra.mxu1 %v2190_v44  ;;  %2021 = vmatprep.subr.bf16.mxu0 %v2191_v45 }
 0x1a3   : > { %2043 = vmatprep.subr.bf16.mxu1 %v2192_v46 }
 0x1a5   : > { %2022 = vmatpush3.bf16.msra.mxu0 %v2193_v47 }
 0x1a6   : > { %2044 = vmatpush3.bf16.msra.mxu1 %v2194_v48  ;;  %2023 = vmatprep.subr.bf16.mxu0 %v2195_v49  ;;  %v2377_v48 = vmov (!%p1962_p6), 0  }
 0x1a7   : > { %2045 = vmatprep.subr.bf16.mxu1 %v2196_v50 }
 0x1a9   : > { %2024 = vmatpush3.bf16.msra.mxu0 %v2197_v51 }
 0x1aa   : > { %2046 = vmatpush3.bf16.msra.mxu1 %v2198_v52  ;;  %2025 = vmatprep.subr.bf16.mxu0 %v2199_v53 }
 0x1ab   : > { %2047 = vmatprep.subr.bf16.mxu1 %v2200_v54 }
 0x1ad   : > { %2026 = vmatpush3.bf16.msra.mxu0 %v2201_v55 }
 0x1ae   : > { %2048 = vmatpush3.bf16.msra.mxu1 %v2202_v56  ;;  %2027 = vmatprep.subr.bf16.mxu0 %v2203_v57 }
 0x1af   : > { %2049 = vmatprep.subr.bf16.mxu1 %v2204_v58 }
 0x1b1   : > { %2028 = vmatpush3.bf16.msra.mxu0 %v2205_v59 }
 0x1b2   : > { %2050 = vmatpush3.bf16.msra.mxu1 %v2206_v60  ;;  %2029 = vmatprep.subr.bf16.mxu0 %v2207_v61 }
 0x1b3   : > { %2051 = vmatprep.subr.bf16.mxu1 %v2208_v62 }
 0x1b5   : > { %2030 = vmatpush3.bf16.msra.mxu0 %v2209_v63 }
 0x1b6   : > { %2052 = vmatpush3.bf16.msra.mxu1 %v2210_v0 }
 0x1b8   : > { %1600 = vmatmul.mubr.bf16.vlgmr.msra.gmra.mrb[4].mxu0 %v1892_v2 }
 0x1b9   : > { %1640 = vmatmul.mubr.bf16.vlgmr.msra.gmra.mrb[4].mxu1 %v1894_v5 }
 0x26b   : > { %v1987_v7 = vpop.f32.mrb[0].mxu0 }
 0x26c   : > { %v2009_v9 = vpop.f32.mrb[0].mxu1  ;;  %v1988_v11 = vpop.f32.mrb[1].mxu0 }
 0x26d   : > { %v2010_v13 = vpop.f32.mrb[1].mxu1  ;;  %v1989_v14 = vadd.f32 %v1988_v11, %v1987_v7  ;;  %v1990_v16 = vpop.f32.mrb[2].mxu0 }
 0x26e   : > { %v2011_v15 = vadd.f32 %v2010_v13, %v2009_v9  ;;  %v2012_v12 = vpop.f32.mrb[2].mxu1  ;;  %v1991_v17 = vpop.f32.mrb[3].mxu0 }
 0x26f   : > { %v2013_v18 = vpop.f32.mrb[3].mxu1  ;;  %v1522_v19 = vadd.f32 %v1989_v14, %v1887_v10 }
 0x271   : > { %v1562_v20 = vadd.f32 %v2011_v15, %v1522_v19 }
 0x28b   : > { %v2031_v21 = vpop.f32.mrb[4].mxu0 }
 0x28c   : > { %v2053_v22 = vpop.f32.mrb[4].mxu1  ;;  %v2032_v23 = vpop.f32.mrb[5].mxu0 }
 0x28d   : > { %v2054_v24 = vpop.f32.mrb[5].mxu1  ;;  %v2033_v25 = vadd.f32 %v2032_v23, %v2031_v21  ;;  %v2034_v27 = vpop.f32.mrb[6].mxu0 }
 0x28e   : > { %v2055_v26 = vadd.f32 %v2054_v24, %v2053_v22  ;;  %v2056_v28 = vpop.f32.mrb[6].mxu1  ;;  %v2035_v29 = vpop.f32.mrb[7].mxu0 }
 0x28f   : > { %v2057_v30 = vpop.f32.mrb[7].mxu1  ;;  %v1602_v31 = vadd.f32 %v2033_v25, %v1562_v20 }
 0x291   : > { %v1642_v32 = vadd.f32 %v2055_v26, %v1602_v31 }
 0x293   : > { %1675 = vst [vmem:[%s1674_s10] sm:$0xff] %v1642_v32  ;;  %1648 = vmax.xlane.f32.xlu0 %v1642_v32 }
 0x29a   : > { %v1685_v53 = vld [vmem:[#allocation10] sm:$0xff] (!%p1962_p6)  ;;  %v1686_v54 = vld [vmem:[#allocation10 + $0x8] sm:$0xff] (!%p1962_p6)  ;;  %v1687_v55 = vld [vmem:[#allocation10 + $0x10] sm:$0xff] (!%p1962_p6) }
 0x320   : > { %v1649_v35 = vpop.xlane.xlu0 %1648 }
 0x321   : > { %v1650_v36 = vmax.f32 %v1647_v34, %v1649_v35 }
 0x323   : > { %v1652_v37 = vsub.f32 %v1647_v34, %v1650_v36  ;;  %1669 = vst.msk [vmem:[#allocation3] sm:$0xff] %vm1667_vm1, %v1650_v36  ;;  %1658 = vperm.xlu0 %2142, %v1650_v36  }
 0x325   : > { %v1653_v41 = vmul.f32 1.442695, %v1652_v37 }
 0x327   : > { %2219 = vset.pattern.permute.xlu0 (!%p1962_p6), %v2377_v48 }
 0x32a   : > { %v1680_v50 = vld [vmem:[#allocation3] sm:$0xff] (!%p1962_p6) }
 0x3a2   : > { %v1659_v38 = vpop.permute.xlu0 %1658 }
 0x3a3   : > { %v1661_v39 = vsub.f32 %v1642_v32, %v1659_v38 }
 0x3a5   : > { %v1662_v8 = vmul.f32 1.442695, %v1661_v39 }
 0x3a7   : > { %2215 = vpow2.f32 %v1662_v8 }
 0x3a8   : > { %2217 = vpow2.f32 %v1653_v41 }
 0x3b1   : > { %v2216_v40 = vpop.eup %2215 }
 0x3b2   : > { %1664 = vadd.xlane.f32.xlu1 %v2216_v40  ;;  %v2218_v42 = vpop.eup %2217 }
 0x3b3   : > { %v1655_v44 = vmul.f32 %v2218_v42, %v1651_v43 }
 0x43c   : > { %1679 = sbr.rel (%p1962_p6) target bundleno = 1245 (0x4dd), region = 56 }
 0x43f   : > { %v1665_v45 = vpop.xlane.xlu1 %1664 }
 0x440   : > { %v1666_v46 = vadd.f32 %v1665_v45, %v1655_v44 }
 0x442   : > { %1668 = vst.msk [vmem:[#allocation4] sm:$0xff] %vm1667_vm1, %v1666_v46 }
 0x449   : > { %v1681_v47 = vld [vmem:[#allocation4] sm:$0xff] }
 0x44a   : > { %2220 = vlog2.f32 %v1681_v47 }
 0x454   : > { %v2221_v49 = vpop.eup %2220 }
 0x455   : > { %v1683_v51 = vmul.f32 0.6931472, %v2221_v49 }
 0x457   : > { %v1684_v52 = vadd.f32 %v1683_v51, %v1680_v50 }
 0x459   : > { %1690 = vperm.xlu0 %2219, %v1684_v52  }
 0x4d8   : > { %v1691_v56 = vpop.permute.xlu0 %1690 }
 0x4d9   : > { %v1693_v57 = vsub.f32 %v1685_v53, %v1691_v56  ;;  %v1694_v58 = vsub.f32 %v1686_v54, %v1691_v56  ;;  %v1695_v59 = vsub.f32 %v1687_v55, %v1691_v56 }
 0x4db   : > { %1696 = vst [vmem:[#allocation10] sm:$0xff] %v1693_v57  ;;  %1697 = vst [vmem:[#allocation10 + $0x8] sm:$0xff] %v1694_v58 }
 0x4dc   : > { %1698 = vst [vmem:[#allocation10 + $0x10] sm:$0xff] %v1695_v59 }
 0x4dd PF: > { %p2650_p9 = scmp.eq.s32.totalorder %s1808_s24, 2  ;;  %s2378_s12 = smov [#allocation10]  }
 0x4de   : > { %s1709_s13 = sshll.u32 %s2378_s12, 4  ;;  %s1710_s13 = int_to_ptr.vmem [resolvable:$true] %s1709_s13 }
 0x4df   : > { %s2280_s6 = scalar_lea.vmem %s1710_s13, 384  ;;  %p2287_p8 = scmp.lt.s32.totalorder %s1710_s13, %s1710_s13 }
 0x4e0   : > { %p2281_p11 = scmp.ne.s32.totalorder %s1710_s13, %s2280_s6  ;;  %p2288_p13 = scmp.lt.s32.totalorder %s2280_s6, %s2280_s6 }
 0x4e2   : > { %p2282_p3 = pnand %p2281_p11, %p2650_p9  ;;  %p2289_p1 = por %p2288_p13, %p2287_p8 }
 0x4e4   : > { %p2283_p7 = pneg %p2282_p3 }
 0x4e6   : > { %p2290_p2 = pnand %p2289_p1, %p2283_p7 }
 0x4e8   : > { %2293 = shalt.err (!%p2290_p2)
}
 0x4e9   : > { %s2294_s24 = scalar_lea.hbm %s2699_s5, 384 }
 0x4ea   : > { %p2295_p12 = scmp.ne.s32.totalorder %s2699_s5, %s2294_s24  ;;  %p2300_p10 = scmp.lt.u32.totalorder %s2294_s24, %s2699_s5 }
 0x4ec   : > { %p2296_p0 = pnand %p2295_p12, %p2650_p9 }
 0x4ee   : > { %p2297_p4 = pneg %p2296_p0 }
 0x4f0   : > { %p2302_p5 = pnand %p2300_p10, %p2297_p4 }
 0x4f2   : > { %2305 = shalt.err (!%p2302_p5)
}
 0x4f3   : > { %2066 = dma.vmem_to_hbm [thread:$0]  (%p2650_p9), %s1710_s13, 384, %s2699_s5, [#allocation7]  }
 0x4f4   : > { %2339 = dma.done.wait (%p2650_p9), [#allocation7], 384  }
 0x4f5   : > { %2341 = vsyncadd (%p2650_p9), [#allocation7], 4294966912 }
 0x4f6 PF: > { %s20_s23 = sadd.s32 1, %s2364_s23   ;;  %s2715_s18 = smov %s2348_s19 }
 0x4f7   : > { %p17_p6 = scmp.ge.s32.totalorder %s20_s23, 5   ;;  %s2716_s19 = smov %s2352_s20 }
 0x4f8   : > { %s2717_s20 = smov %s2507_s16  ;;  %s2718_s21 = smov %s2360_s22 }
 0x4f9   : > { %s2719_s22 = smov %s2721_s8  ;;  %19 = sbr.rel (!%p17_p6) target bundleno = 6 (0x6), region = 98 }
 0x500   :  { %1722 = vsyncpa [#allocation6], 1 }
 0x501   :  { %1724 = vsyncpa [#allocation6 + $0x1], 1 }
 0x502   :  { %1725 = vsyncpa [#allocation9], 1 }
 0x503   :  { %1727 = vsyncpa [#allocation9 + $0x1], 1 }
 0x504   :  { %1728 = vsyncpa [#allocation7], 1 }
 0x505   :  { %1730 = vsyncpa [#allocation7 + $0x1], 1 }

</bundles_post_ra>
